<compile_context>
chip_gen: v7x
topology: tpu7x:2x2x1
jax: 0.10.0
libtpu: 0.0.40
codegen_flags: <defaults>
</compile_context>

<pallas_src>
import math
import functools

import jax
import jax.numpy as jnp
from jax.experimental import pallas as pl
from jax.experimental.pallas import tpu as pltpu


# --------------------------------------------------------------------------
# PE table construction (parameter setup, plain JAX, deterministic)
# --------------------------------------------------------------------------
def build_pe_table(d_model: int, max_seq_len: int) -> jnp.ndarray:
    pos = jnp.arange(max_seq_len, dtype=jnp.float32)[:, None]          # (S, 1)
    col = jnp.arange(d_model, dtype=jnp.float32)[None, :]              # (1, D)
    # divisor exactly as the torch loop writes it: 10000 ** (2*col / d_model)
    div = jnp.power(10000.0, 2.0 * col / float(d_model))               # (1, D)
    angles = pos / div                                                  # (S, D)
    is_even = (jnp.arange(d_model) % 2 == 0)[None, :]
    pe = jnp.where(is_even, jnp.sin(angles), jnp.cos(angles))
    return pe.astype(jnp.float32)                                       # (S, D)


# --------------------------------------------------------------------------
# Pallas kernels
# --------------------------------------------------------------------------
def _pe_add_kernel(x_ref, pe_ref, o_ref, *, scale):
    # x_ref, pe_ref, o_ref: (tR, C) — same shape, no broadcast needed.
    o_ref[...] = x_ref[...] * scale + pe_ref[...]


def _pe_add_dropout_kernel(x_ref, pe_ref, bits_ref, o_ref, *,
                           scale, inv_keep, threshold):
    # Integer-domain Bernoulli: keep iff bits < keep_prob * 2^32 (no int->float
    # convert, no extra multiply, no 1.0-rounding artifact).
    y = x_ref[...] * scale + pe_ref[...]
    keep = bits_ref[...] < jnp.uint32(threshold)
    o_ref[...] = jnp.where(keep, y * inv_keep, jnp.zeros_like(y))


# --------------------------------------------------------------------------
# Layout / tiling choice
# --------------------------------------------------------------------------
def _choose_layout(S, D, itemsize):
    """Per-batch 2-D view (R, C) with a lane-dense last dim when possible,
    plus a row-tile tR (multiple of 8, or full R)."""
    if D % 128 == 0:
        R, C = S, D
    elif (S * D) % 128 == 0 and (S * D) * itemsize <= (1 << 21):
        # Small slice whose total is lane-aligned: fold it all into the lane axis
        # (avoids masked vst partial stores when D < 128, e.g. the demo's D=32).
        R, C = 1, S * D
    else:
        R, C = S, D  # last dim equals full D (always legal; masked stores if D<128)

    # ~2 MiB per tile keeps double-buffered x / pe / bits / out well inside the
    # 32 MiB scoped-VMEM default on every generation (incl. v7x's 64 MiB VMEM).
    target_rows = max(1, (1 << 21) // (C * itemsize))
    if R <= target_rows:
        tR = R                      # full dim -> always legal
    else:
        tR = max(8, (target_rows // 8) * 8)   # multiple of 8; partial last block OK
    return R, C, tR


# --------------------------------------------------------------------------
# Wrapper
# --------------------------------------------------------------------------
def positional_encoder(x, pe_table, *, d_model, dropout_p=0.1,
                       training=False, seed=0):
    """x: (B, S, D).  pe_table: (max_seq_len, D)."""
    B, S, D = x.shape
    assert D == d_model
    scale = math.sqrt(d_model)
    itemsize = jnp.dtype(x.dtype).itemsize

    # Cast PE to the activation dtype so a bf16 x is not silently promoted.
    pe = pe_table[:S, :].astype(x.dtype)

    R, C, tR = _choose_layout(S, D, itemsize)
    x2 = x.reshape(B, R, C)
    pe2 = pe.reshape(R, C)
    grid = (B, pl.cdiv(R, tR))

    x_spec = pl.BlockSpec((None, tR, C), lambda b, r: (b, r, 0))
    pe_spec = pl.BlockSpec((tR, C), lambda b, r: (r, 0))
    out_spec = pl.BlockSpec((None, tR, C), lambda b, r: (b, r, 0))
    cparams = pltpu.CompilerParams(
        dimension_semantics=("parallel", "parallel"))

    use_dropout = training and dropout_p > 0.0
    if use_dropout and dropout_p >= 1.0:
        # nn.Dropout(p=1.0) in training zeroes everything; avoid 1/keep_prob = inf.
        return jnp.zeros_like(x)

    if not use_dropout:
        cost = pl.CostEstimate(
            flops=2 * B * S * D,
            transcendentals=0,
            bytes_accessed=(2 * B * S * D + S * D) * itemsize)
        kernel = functools.partial(_pe_add_kernel, scale=scale)
        out2 = pl.pallas_call(
            kernel,
            out_shape=jax.ShapeDtypeStruct((B, R, C), x.dtype),
            grid=grid,
            in_specs=[x_spec, pe_spec],
            out_specs=out_spec,
            compiler_params=cparams,
            cost_estimate=cost,
        )(x2, pe2)
        return out2.reshape(B, S, D)

    # Training-mode dropout (inverted dropout, like nn.Dropout).
    keep_prob = 1.0 - float(dropout_p)
    threshold = min(int(round(keep_prob * 2.0 ** 32)), 2 ** 32 - 1)
    bits = jax.random.bits(jax.random.PRNGKey(seed), (B, R, C), dtype=jnp.uint32)
    bits_spec = pl.BlockSpec((None, tR, C), lambda b, r: (b, r, 0))

    cost = pl.CostEstimate(
        flops=4 * B * S * D,
        transcendentals=0,
        bytes_accessed=(2 * B * S * D + S * D) * itemsize + B * S * D * 4)
    kernel = functools.partial(_pe_add_dropout_kernel, scale=scale,
                               inv_keep=1.0 / keep_prob, threshold=threshold)
    out2 = pl.pallas_call(
        kernel,
        out_shape=jax.ShapeDtypeStruct((B, R, C), x.dtype),
        grid=grid,
        in_specs=[x_spec, pe_spec, bits_spec],
        out_specs=out_spec,
        compiler_params=cparams,
        cost_estimate=cost,
    )(x2, pe2, bits)
    return out2.reshape(B, S, D)


# --------------------------------------------------------------------------
# Reference (pure JAX) for correctness check
# --------------------------------------------------------------------------
def positional_encoder_ref(x, pe_table, *, d_model):
    S = x.shape[1]
    return x * math.sqrt(d_model) + pe_table[None, :S, :]


if __name__ == "__main__":
    # Small shapes consistent with the module: batch=2, seq=8, d_model=32.
    B, S, D = 2, 8, 32
    max_seq_len = 200

    key = jax.random.PRNGKey(0)
    x = jax.random.normal(key, (B, S, D), dtype=jnp.float32)
    pe_table = build_pe_table(D, max_seq_len)
    ref = positional_encoder_ref(x, pe_table, d_model=D)

    # Eval-mode (dropout = identity) -- exact match vs reference.
    out = positional_encoder(x, pe_table, d_model=D, training=False)
    out = jax.block_until_ready(out)
    assert out.shape == (B, S, D)
    assert jnp.allclose(out, ref, atol=1e-5, rtol=1e-5), "mismatch vs reference"

    # Training-mode dropout path (statistics match nn.Dropout(p=0.1); the exact
    # RNG stream differs from torch by construction).
    dropout_p = 0.1
    out_train = positional_encoder(x, pe_table, d_model=D,
                                   dropout_p=dropout_p, training=True, seed=1234)
    out_train = jax.block_until_ready(out_train)
    assert out_train.shape == (B, S, D)
    keep_prob = 1.0 - dropout_p
    scaled = ref / keep_prob
    is_zero = jnp.isclose(out_train, 0.0, atol=1e-6)
    is_kept = jnp.isclose(out_train, scaled, atol=1e-4, rtol=1e-4)
    assert bool(jnp.all(is_zero | is_kept)), "dropout output is not {0, y/keep_prob}"
    # TODO(synk): torch's dropout RNG stream cannot be reproduced bit-exactly.

    print("KERNEL_OK")
</pallas_src>

<mosaic_0001>
module attributes {stable_mosaic.version = 11 : i64} {
  func.func @_pe_add_kernel(%arg0: i32, %arg1: i32, %arg2: memref<1x1x256xf32, #tpu.memory_space<vmem>>, %arg3: memref<1x256xf32, #tpu.memory_space<vmem>>, %arg4: memref<1x1x256xf32, #tpu.memory_space<vmem>>) attributes {dimension_semantics = [#tpu.dimension_semantics<parallel>, #tpu.dimension_semantics<parallel>], iteration_bounds = array<i64: 2, 1>, scalar_prefetch = 0 : i64, scratch_operands = 0 : i64, tpu.core_type = #tpu.core_type<tc>, window_params = [{transform_indices = @transform_0, window_bounds = array<i64: 1, 1, 256>}, {transform_indices = @transform_1, window_bounds = array<i64: 1, 256>}, {transform_indices = @transform_2, window_bounds = array<i64: 1, 1, 256>}]} {
    %c0 = arith.constant 0 : index
    %c0_0 = arith.constant 0 : index
    %c0_1 = arith.constant 0 : index
    %0 = vector.load %arg2[%c0, %c0_0, %c0_1] : memref<1x1x256xf32, #tpu.memory_space<vmem>>, vector<1x1x256xf32>
    %1 = vector.shape_cast %0 : vector<1x1x256xf32> to vector<1x256xf32>
    %cst = arith.constant 5.65685415 : f32
    %2 = vector.broadcast %cst : f32 to vector<1x256xf32>
    %3 = arith.mulf %1, %2 : vector<1x256xf32>
    %c0_2 = arith.constant 0 : index
    %c0_3 = arith.constant 0 : index
    %4 = vector.load %arg3[%c0_2, %c0_3] : memref<1x256xf32, #tpu.memory_space<vmem>>, vector<1x256xf32>
    %5 = arith.addf %3, %4 : vector<1x256xf32>
    %c0_4 = arith.constant 0 : index
    %c0_5 = arith.constant 0 : index
    %c0_6 = arith.constant 0 : index
    %6 = vector.load %arg4[%c0_4, %c0_5, %c0_6] : memref<1x1x256xf32, #tpu.memory_space<vmem>>, vector<1x1x256xf32>
    %7 = vector.shape_cast %6 : vector<1x1x256xf32> to vector<1x256xf32>
    %8 = vector.shape_cast %5 : vector<1x256xf32> to vector<1x1x256xf32>
    tpu.vector_store %arg4[%c0_4, %c0_5, %c0_6], %8 {strides = array<i32>} : memref<1x1x256xf32, #tpu.memory_space<vmem>>, vector<1x1x256xf32>,
    return
  }
  func.func @transform_0(%arg0: i32, %arg1: i32) -> (i32, i32, i32) {
    %c0_i32 = arith.constant 0 : i32
    %c0_i32_0 = arith.constant 0 : i32
    return %arg0, %arg1, %c0_i32 : i32, i32, i32
  }
  func.func @transform_1(%arg0: i32, %arg1: i32) -> (i32, i32) {
    %c0_i32 = arith.constant 0 : i32
    %c0_i32_0 = arith.constant 0 : i32
    return %arg1, %c0_i32 : i32, i32
  }
  func.func @transform_2(%arg0: i32, %arg1: i32) -> (i32, i32, i32) {
    %c0_i32 = arith.constant 0 : i32
    %c0_i32_0 = arith.constant 0 : i32
    return %arg0, %arg1, %c0_i32 : i32, i32, i32
  }
}

</mosaic_0001>

<bundles_post_ra>
// kernel: tpu_custom_call.1
= control target key start
LH: loop header
LB: loop body
LE: loop exit
PB: predicated region body
PF: predicated region fallthrough
CT: control target
= control target key end

     0   :  { %7 = vsyncpa [#allocation3], 0  ;;  %s706_s0 = inlined_call_operand.hbm [shape: f32[2,1,256], index: 0, kind: input, shape index: {}]   ;;  %s707_s1 = inlined_call_operand.vmem [shape: f32[1,256], index: 1, kind: input, shape index: {}]   ;;  %s708_s2 = inlined_call_operand.hbm [shape: f32[2,1,256], index: 2, kind: output, shape index: {}]  }
   0x1   :  { %9 = vsyncpa [#allocation3 + $0x1], 0 }
   0x2   :  { %10 = vsyncpa [#allocation4], 0 }
   0x3   :  { %12 = vsyncpa [#allocation4 + $0x1], 0  ;;  %s531_s9 = smov 0   ;;  %s533_s10 = smov 0  }
   0x4   :  { %s535_s11 = smov 0   ;;  %s537_s12 = smov 0  }
   0x5   :  { %s539_s13 = smov 0   ;;  %s541_s14 = smov 0  }
   0x6 LB: > { %s320_s15 = sadd.s32 4294967295, %s512_s14   ;;  %s321_s16 = sadd.s32 4294967294, %s512_s14   ;;  %s512_s14 = sphi %s541_s14, %s18_s14   ;;  %s508_s13 = sphi %s539_s13, %s724_s13   ;;  %s504_s12 = sphi %s537_s12, %s723_s12   ;;  %s500_s11 = sphi %s535_s11, %s722_s11   ;;  %s496_s10 = sphi %s533_s10, %s721_s10   ;;  %s492_s9 = sphi %s531_s9, %s720_s9  }
   0x7   : > { %s30_s17 = sadd.s32 1, %s508_s13  ;;  %s39_s18 = sadd.s32 1, %s500_s11 }
   0x8   : > { %p32_p0 = scmp.ge.s32.totalorder %s30_s17, 2  ;;  %p46_p1 = scmp.ne.s32.totalorder %s500_s11, %s496_s10 }
   0x9   : > { %p47_p2 = scmp.eq.s32.totalorder %s512_s14, 0  ;;  %p52_p3 = scmp.ne.s32.totalorder %s496_s10, %s492_s9 }
   0xa   : > { %s726_s17 = smov (%p32_p0, %s30_s17), 0  ;;  %p53_p5 = scmp.eq.s32.totalorder %s320_s15, 0 }
   0xb   : > { %p572_p4 = por %p47_p2, %p46_p1  ;;  %s34_s20 = ssub.s32 %s508_s13, %s726_s17 }
   0xc   : > { %p104_p6 = scmp.eq.s32.totalorder %s320_s15, 1  ;;  %p37_p7 = scmp.eq.s32.totalorder %s34_s20, 0 }
   0xd   : > { %p578_p8 = por %p53_p5, %p52_p3  ;;  %p110_p10 = scmp.eq.s32.totalorder %s321_s16, 1 }
   0xe   : > { %p582_p9 = por %p104_p6, %p46_p1  ;;  %p350_p13 = scmp.lt.s32.totalorder %s512_s14, 2 }
   0xf   : > { %s587_s23 = scalar_select %p37_p7, %s500_s11, %s39_s18  }
  0x10   : > { %s712_s22 = scalar_select %p582_p9, 1, 0 }
  0x11   : > { %p589_p11 = por %p110_p10, %p52_p3  ;;  %s137_s25 = sand.u32 1, %s500_s11  }
  0x12   : > { %s325_s26 = sshll.u32 %s137_s25, 1  ;;  %s336_s27 = sshll.u32 %s508_s13, 5 }
  0x13   : > { %s713_s24 = scalar_select %p589_p11, 1, 0 }
  0x14   : > { %s600_s30 = scalar_lea.hbm %s706_s0, %s336_s27  ;;  %s141_s3 = scalar_lea.vmem [#allocation2], %s325_s26 }
  0x15   : > { %s151_s4 = sshll.u32 %s141_s3, 4  ;;  %p606_p0 = pnand %p350_p13, %p572_p4  ;;  %s602_s4 = int_to_ptr.vmem [resolvable:$true] %s151_s4 }
  0x16   : > { %s138_s6 = scalar_lea.sflag [#allocation3], %s137_s25  ;;  %s400_s7 = scalar_lea.hbm %s600_s30, 32 }
  0x17   : > { %p401_p3 = scmp.ne.s32.totalorder %s600_s30, %s400_s7  ;;  %p402_p5 = pneg %p606_p0 }
  0x18   : > { %s405_s16 = scalar_lea.hbm %s706_s0, 64  ;;  %p406_p4 = scmp.lt.u32.totalorder %s600_s30, %s706_s0 }
  0x19   : > { %p403_p6 = pnand %p402_p5, %p401_p3  ;;  %p407_p10 = scmp.lt.u32.totalorder %s405_s16, %s400_s7 }
  0x1a   : > { %p409_p12 = scmp.lt.u32.totalorder %s400_s7, %s600_s30 }
  0x1b   : > { %p404_p7 = pneg %p403_p6  ;;  %p408_p13 = por %p407_p10, %p406_p4 }
  0x1d   : > { %p410_p1 = por %p409_p12, %p408_p13 }
  0x1f   : > { %p411_p2 = pnand %p410_p1, %p404_p7 }
  0x21   : > { %414 = shalt.err (!%p411_p2)
}
  0x22   : > { %s415_s20 = scalar_lea.vmem %s602_s4, 32  ;;  %s514_s25 = smov [#allocation2]  }
  0x23   : > { %p416_p3 = scmp.ne.s32.totalorder %s602_s4, %s415_s20  ;;  %s420_s26 = sshll.u32 %s514_s25, 4  ;;  %s421_s26 = int_to_ptr.vmem [resolvable:$false] %s420_s26 }
  0x24   : > { %s422_s27 = scalar_lea.vmem %s421_s26, 64  ;;  %p423_p9 = scmp.lt.s32.totalorder %s602_s4, %s421_s26 }
  0x25   : > { %p418_p6 = pnand %p416_p3, %p402_p5  ;;  %p424_p4 = scmp.lt.s32.totalorder %s422_s27, %s415_s20 }
  0x27   : > { %p419_p11 = pneg %p418_p6  ;;  %p425_p10 = por %p424_p4, %p423_p9 }
  0x29   : > { %p426_p12 = pnand %p425_p10, %p419_p11 }
  0x2b   : > { %429 = shalt.err (!%p426_p12)
}
  0x2c   : > { %345 = dma.hbm_to_vmem [thread:$0]  (!%p606_p0), %s600_s30, 32, %s602_s4, %s138_s6  }
  0x2d   : > { %p715_p1 = scmp.lt.s32.totalorder %s512_s14, 3  ;;  %p716_p2 = scmp.ge.s32.totalorder %s512_s14, 1 }
  0x2f   : > { %p157_p5 = pnand %p716_p2, %p715_p1 }
  0x30   : > { %s642_s28 = sand.u32 (!%p157_p5), 1, %s496_s10  }
  0x31   : > { %160 = sbr.rel (%p157_p5) target bundleno = 83 (0x53), region = 28  ;;  %s329_s29 = sshll.u32 (!%p157_p5), %s642_s28, 1 }
  0x32   : > { %s163_s3 = scalar_lea.sflag (!%p157_p5), [#allocation3], %s642_s28  ;;  %s166_s7 = scalar_lea.vmem (!%p157_p5), [#allocation2], %s329_s29 }
  0x38   : > { %483 = dma.done.wait (%p578_p8), %s163_s3, 32  }
  0x39   : > { %485 = vsyncadd (%p578_p8), %s163_s3, 4294967264  ;;  %v199_v0 = vlaneseq  ;;  %v195_v1 = vld [vmem:[%s166_s7] sm:$0x3]  ;;  %s190_s5 = scalar_lea.vmem [#allocation5], %s329_s29  ;;  %s337_s8 = sshll.u32 %s504_s12, 5 }
  0x3a   : > { %v197_v2 = vld [vmem:[%s707_s1] sm:$0x3]  ;;  %s221_s6 = sshll.u32 %s190_s5, 4  ;;  %v196_v3 = vmul.f32 5.656854, %v195_v1  ;;  %s659_s16 = scalar_lea.hbm %s708_s2, %s337_s8  ;;  %s654_s6 = int_to_ptr.vmem [resolvable:$true] %s221_s6 }
  0x3b   : > { %vm201_vm0 = vcmp.lt.s32.totalorder %v199_v0, 256  ;;  %s205_s18 = scalar_lea.sflag [#allocation4], %s642_s28  ;;  %s430_s19 = scalar_lea.vmem %s654_s6, 32 }
  0x3c   : > { %v198_v4 = vadd.f32 %v197_v2, %v196_v3  ;;  %p431_p8 = scmp.ne.s32.totalorder %s654_s6, %s430_s19  ;;  %p717_p9 = scmp.ne.s32.totalorder %s712_s22, 0 }
  0x3d   : > { %s515_s12 = smov [#allocation5]  }
  0x3e   : > { %203 = vst.msk [vmem:[%s190_s5] sm:$0x3] %vm201_vm0, %v198_v4  ;;  %p432_p11 = pnand %p431_p8, %p717_p9  ;;  %s434_s20 = sshll.u32 %s515_s12, 4  ;;  %s435_s20 = int_to_ptr.vmem [resolvable:$false] %s434_s20 }
  0x3f   : > { %s436_s25 = scalar_lea.vmem %s435_s20, 64  ;;  %p437_p7 = scmp.lt.s32.totalorder %s654_s6, %s435_s20 }
  0x40   : > { %p433_p0 = pneg %p432_p11  ;;  %p438_p13 = scmp.lt.s32.totalorder %s436_s25, %s430_s19 }
  0x42   : > { %p439_p3 = por %p438_p13, %p437_p7 }
  0x44   : > { %p440_p6 = pnand %p439_p3, %p433_p0 }
  0x46   : > { %443 = shalt.err (!%p440_p6)
}
  0x47   : > { %s444_s26 = scalar_lea.hbm %s659_s16, 32  ;;  %s448_s29 = scalar_lea.hbm %s708_s2, 64 }
  0x48   : > { %p445_p4 = scmp.ne.s32.totalorder %s659_s16, %s444_s26  ;;  %p449_p1 = scmp.lt.u32.totalorder %s659_s16, %s708_s2 }
  0x49   : > { %p450_p2 = scmp.lt.u32.totalorder %s448_s29, %s444_s26  ;;  %p452_p8 = scmp.lt.u32.totalorder %s444_s26, %s659_s16 }
  0x4a   : > { %p446_p10 = pnand %p445_p4, %p717_p9 }
  0x4b   : > { %p451_p5 = por %p450_p2, %p449_p1 }
  0x4c   : > { %p447_p12 = pneg %p446_p10 }
  0x4d   : > { %p453_p11 = por %p452_p8, %p451_p5 }
  0x4f   : > { %p454_p0 = pnand %p453_p11, %p447_p12 }
  0x51   : > { %457 = shalt.err (!%p454_p0)
}
  0x52   : > { %340 = dma.vmem_to_hbm [thread:$0]  (%p717_p9), %s654_s6, 32, %s659_s16, %s205_s18  }
  0x53 PF: > { %s233_s30 = sand.u32 1, %s492_s9   ;;  %p718_p7 = scmp.ne.s32.totalorder %s713_s24, 0 }
  0x54   : > { %p719_p13 = scmp.ge.s32.totalorder %s512_s14, 2  ;;  %s234_s4 = scalar_lea.sflag [#allocation4], %s233_s30 }
  0x56   : > { %p347_p3 = pnand %p719_p13, %p718_p7 }
  0x58   : > { %487 = dma.done.wait (!%p347_p3), %s234_s4, 32  }
  0x59   : > { %489 = vsyncadd (!%p347_p3), %s234_s4, 4294967264  ;;  %s18_s14 = sadd.s32 1, %s512_s14   ;;  %s720_s9 = smov %s496_s10 }
  0x5a   : > { %p15_p6 = scmp.ge.s32.totalorder %s18_s14, 4   ;;  %s721_s10 = smov %s500_s11 }
  0x5b   : > { %s722_s11 = smov %s587_s23  ;;  %s723_s12 = smov %s508_s13 }
  0x5c   : > { %s724_s13 = smov %s726_s17  ;;  %17 = sbr.rel (!%p15_p6) target bundleno = 6 (0x6), region = 76 }
  0x63   :  { %239 = vsyncpa [#allocation3], 1 }
  0x64   :  { %241 = vsyncpa [#allocation3 + $0x1], 1 }
  0x65   :  { %242 = vsyncpa [#allocation4], 1 }
  0x66   :  { %244 = vsyncpa [#allocation4 + $0x1], 1 }

</bundles_post_ra>
